<compile_context>
chip_gen: v6e
topology: v6e:2x2x1
jax: 0.10.0
libtpu: 0.0.40
codegen_flags: <defaults>
</compile_context>

<pallas_src>
import jax
import jax.numpy as jnp
from jax.experimental import pallas as pl
from jax.experimental.pallas import tpu as pltpu


def _round_up(n, m):
    return ((n + m - 1) // m) * m


def debugnet_kernel(w1_ref, b1_ref, w2_ref, b2_ref, x_ref, o_ref):
    """x_ref/o_ref: (2, TB) batch-on-lanes tiles; params are flat SMEM scalars.

    w1_ref: (10,) = Linear(2,5).weight flattened row-major (w1[j, k] -> w1_ref[2j+k])
    b1_ref: (5,)
    w2_ref: (10,) = Linear(5,2).weight flattened row-major (w2[i, j] -> w2_ref[5i+j])
    b2_ref: (2,)
    """
    x = x_ref[...]                      # (2, TB) f32, lane-dense
    x0 = x[0:1, :]                      # (1, TB)
    x1 = x[1:2, :]                      # (1, TB)

    # Layer 1: h_j = tanh(w1[j,0]*x0 + w1[j,1]*x1 + b1[j])  -- unrolled VPU MACs,
    # tanh goes to the EUP slot (co-issues with the VALU work).
    h = []
    for j in range(5):
        hj = jnp.tanh(w1_ref[2 * j] * x0 + w1_ref[2 * j + 1] * x1 + b1_ref[j])
        h.append(hj)                    # (1, TB)

    # Layer 2: y_i = sum_j w2[i,j]*h_j + b2[i]
    rows = []
    for i in range(2):
        acc = w2_ref[5 * i] * h[0]
        for j in range(1, 5):
            acc = acc + w2_ref[5 * i + j] * h[j]
        rows.append(acc + b2_ref[i])    # (1, TB)

    # Single unmasked, lane-dense store of the whole (2, TB) output tile.
    o_ref[...] = jnp.concatenate(rows, axis=0).astype(o_ref.dtype)


def debugnet_forward(x, w1, b1, w2, b2, *, batch_tile=1024):
    """x: (B, 2); w1: (5, 2); b1: (5,); w2: (2, 5); b2: (2,)  (PyTorch Linear layout)."""
    B, f_in = x.shape
    assert f_in == 2, "DebugNet expects 2 input features"

    # Batch tile: a multiple of 128 lanes, capped so tiny batches only pad to 128.
    tb = min(batch_tile, _round_up(max(B, 1), 128))
    b_pad = _round_up(B, tb)

    # Flip layout: batch on the lane (last) axis; zero-pad ragged tail.
    x_t = jnp.transpose(x.astype(jnp.float32))          # (2, B)
    if b_pad != B:
        x_t = jnp.pad(x_t, ((0, 0), (0, b_pad - B)))    # (2, b_pad)

    # Flatten params to 1-D so their SMEM footprint is a few dozen bytes.
    w1f = w1.astype(jnp.float32).reshape(-1)            # (10,)
    b1f = b1.astype(jnp.float32).reshape(-1)            # (5,)
    w2f = w2.astype(jnp.float32).reshape(-1)            # (10,)
    b2f = b2.astype(jnp.float32).reshape(-1)            # (2,)

    smem_spec = pl.BlockSpec(memory_space=pltpu.MemorySpace.SMEM)
    grid = (b_pad // tb,)

    out_t = pl.pallas_call(
        debugnet_kernel,
        out_shape=jax.ShapeDtypeStruct((2, b_pad), jnp.float32),
        grid=grid,
        in_specs=[smem_spec, smem_spec, smem_spec, smem_spec,      # params: resident, DMA'd once
                  pl.BlockSpec((2, tb), lambda i: (0, i))],        # x tile: double-buffered
        out_specs=pl.BlockSpec((2, tb), lambda i: (0, i)),
        compiler_params=pltpu.CompilerParams(
            dimension_semantics=("parallel",),          # shard batch tiles across TCs on v7x
            vmem_limit_bytes=16 * 1024 * 1024,          # tiny tiles; safe on v5e/v6e/v7x
        ),
        cost_estimate=pl.CostEstimate(
            flops=40 * b_pad, transcendentals=5 * b_pad, bytes_accessed=16 * b_pad),
    )(w1f, b1f, w2f, b2f, x_t)

    # Back to PyTorch layout, drop batch padding.
    return jnp.transpose(out_t)[:B, :]


if __name__ == "__main__":
    key = jax.random.PRNGKey(0)
    k_x, k_w1, k_b1, k_w2, k_b2 = jax.random.split(key, 5)

    B = 2
    # Input matches nn.Linear(2, 5): features = 2.
    x = jax.random.normal(k_x, (B, 2), dtype=jnp.float32)

    # Deterministic parameter init (PyTorch Linear shapes: (out, in) weight, (out,) bias).
    w1 = jax.random.normal(k_w1, (5, 2), dtype=jnp.float32) * 0.5
    b1 = jax.random.normal(k_b1, (5,), dtype=jnp.float32) * 0.1
    w2 = jax.random.normal(k_w2, (2, 5), dtype=jnp.float32) * 0.5
    b2 = jax.random.normal(k_b2, (2,), dtype=jnp.float32) * 0.1

    out = debugnet_forward(x, w1, b1, w2, b2)
    out = jax.block_until_ready(out)

    # Pure-JAX reference check (same math as the PyTorch forward).
    ref = jnp.tanh(x @ w1.T + b1) @ w2.T + b2
    assert out.shape == (B, 2)
    assert jnp.allclose(out, ref, atol=1e-5, rtol=1e-5)

    print("KERNEL_OK")
</pallas_src>

<mosaic_0001>
module attributes {stable_mosaic.version = 11 : i64} {
  func.func @debugnet_kernel(%arg0: i32, %arg1: memref<10xf32, #tpu.memory_space<smem>>, %arg2: memref<5xf32, #tpu.memory_space<smem>>, %arg3: memref<10xf32, #tpu.memory_space<smem>>, %arg4: memref<2xf32, #tpu.memory_space<smem>>, %arg5: memref<2x128xf32, #tpu.memory_space<vmem>>, %arg6: memref<2x128xf32, #tpu.memory_space<vmem>>) attributes {dimension_semantics = [#tpu.dimension_semantics<parallel>], iteration_bounds = array<i64: 1>, scalar_prefetch = 0 : i64, scratch_operands = 0 : i64, tpu.core_type = #tpu.core_type<tc>, window_params = [{transform_indices = @transform_0, window_bounds = array<i64: 10>}, {transform_indices = @transform_1, window_bounds = array<i64: 5>}, {transform_indices = @transform_2, window_bounds = array<i64: 10>}, {transform_indices = @transform_3, window_bounds = array<i64: 2>}, {transform_indices = @transform_4, window_bounds = array<i64: 2, 128>}, {transform_indices = @transform_5, window_bounds = array<i64: 2, 128>}]} {
    %c0 = arith.constant 0 : index
    %c0_0 = arith.constant 0 : index
    %0 = vector.load %arg5[%c0, %c0_0] : memref<2x128xf32, #tpu.memory_space<vmem>>, vector<2x128xf32>
    %1 = vector.extract_strided_slice %0 {offsets = [0, 0], sizes = [1, 128], strides = [1, 1]} : vector<2x128xf32> to vector<1x128xf32>
    %2 = vector.extract_strided_slice %0 {offsets = [1, 0], sizes = [1, 128], strides = [1, 1]} : vector<2x128xf32> to vector<1x128xf32>
    %c0_1 = arith.constant 0 : index
    %3 = memref.load %arg1[%c0_1] : memref<10xf32, #tpu.memory_space<smem>>
    %4 = vector.broadcast %3 : f32 to vector<1x128xf32>
    %5 = arith.mulf %4, %1 : vector<1x128xf32>
    %c1 = arith.constant 1 : index
    %6 = memref.load %arg1[%c1] : memref<10xf32, #tpu.memory_space<smem>>
    %7 = vector.broadcast %6 : f32 to vector<1x128xf32>
    %8 = arith.mulf %7, %2 : vector<1x128xf32>
    %9 = arith.addf %5, %8 : vector<1x128xf32>
    %c0_2 = arith.constant 0 : index
    %10 = memref.load %arg2[%c0_2] : memref<5xf32, #tpu.memory_space<smem>>
    %11 = vector.broadcast %10 : f32 to vector<1x128xf32>
    %12 = arith.addf %9, %11 : vector<1x128xf32>
    %13 = math.tanh %12 : vector<1x128xf32>
    %c2 = arith.constant 2 : index
    %14 = memref.load %arg1[%c2] : memref<10xf32, #tpu.memory_space<smem>>
    %15 = vector.broadcast %14 : f32 to vector<1x128xf32>
    %16 = arith.mulf %15, %1 : vector<1x128xf32>
    %c3 = arith.constant 3 : index
    %17 = memref.load %arg1[%c3] : memref<10xf32, #tpu.memory_space<smem>>
    %18 = vector.broadcast %17 : f32 to vector<1x128xf32>
    %19 = arith.mulf %18, %2 : vector<1x128xf32>
    %20 = arith.addf %16, %19 : vector<1x128xf32>
    %c1_3 = arith.constant 1 : index
    %21 = memref.load %arg2[%c1_3] : memref<5xf32, #tpu.memory_space<smem>>
    %22 = vector.broadcast %21 : f32 to vector<1x128xf32>
    %23 = arith.addf %20, %22 : vector<1x128xf32>
    %24 = math.tanh %23 : vector<1x128xf32>
    %c4 = arith.constant 4 : index
    %25 = memref.load %arg1[%c4] : memref<10xf32, #tpu.memory_space<smem>>
    %26 = vector.broadcast %25 : f32 to vector<1x128xf32>
    %27 = arith.mulf %26, %1 : vector<1x128xf32>
    %c5 = arith.constant 5 : index
    %28 = memref.load %arg1[%c5] : memref<10xf32, #tpu.memory_space<smem>>
    %29 = vector.broadcast %28 : f32 to vector<1x128xf32>
    %30 = arith.mulf %29, %2 : vector<1x128xf32>
    %31 = arith.addf %27, %30 : vector<1x128xf32>
    %c2_4 = arith.constant 2 : index
    %32 = memref.load %arg2[%c2_4] : memref<5xf32, #tpu.memory_space<smem>>
    %33 = vector.broadcast %32 : f32 to vector<1x128xf32>
    %34 = arith.addf %31, %33 : vector<1x128xf32>
    %35 = math.tanh %34 : vector<1x128xf32>
    %c6 = arith.constant 6 : index
    %36 = memref.load %arg1[%c6] : memref<10xf32, #tpu.memory_space<smem>>
    %37 = vector.broadcast %36 : f32 to vector<1x128xf32>
    %38 = arith.mulf %37, %1 : vector<1x128xf32>
    %c7 = arith.constant 7 : index
    %39 = memref.load %arg1[%c7] : memref<10xf32, #tpu.memory_space<smem>>
    %40 = vector.broadcast %39 : f32 to vector<1x128xf32>
    %41 = arith.mulf %40, %2 : vector<1x128xf32>
    %42 = arith.addf %38, %41 : vector<1x128xf32>
    %c3_5 = arith.constant 3 : index
    %43 = memref.load %arg2[%c3_5] : memref<5xf32, #tpu.memory_space<smem>>
    %44 = vector.broadcast %43 : f32 to vector<1x128xf32>
    %45 = arith.addf %42, %44 : vector<1x128xf32>
    %46 = math.tanh %45 : vector<1x128xf32>
    %c8 = arith.constant 8 : index
    %47 = memref.load %arg1[%c8] : memref<10xf32, #tpu.memory_space<smem>>
    %48 = vector.broadcast %47 : f32 to vector<1x128xf32>
    %49 = arith.mulf %48, %1 : vector<1x128xf32>
    %c9 = arith.constant 9 : index
    %50 = memref.load %arg1[%c9] : memref<10xf32, #tpu.memory_space<smem>>
    %51 = vector.broadcast %50 : f32 to vector<1x128xf32>
    %52 = arith.mulf %51, %2 : vector<1x128xf32>
    %53 = arith.addf %49, %52 : vector<1x128xf32>
    %c4_6 = arith.constant 4 : index
    %54 = memref.load %arg2[%c4_6] : memref<5xf32, #tpu.memory_space<smem>>
    %55 = vector.broadcast %54 : f32 to vector<1x128xf32>
    %56 = arith.addf %53, %55 : vector<1x128xf32>
    %57 = math.tanh %56 : vector<1x128xf32>
    %c0_7 = arith.constant 0 : index
    %58 = memref.load %arg3[%c0_7] : memref<10xf32, #tpu.memory_space<smem>>
    %59 = vector.broadcast %58 : f32 to vector<1x128xf32>
    %60 = arith.mulf %59, %13 : vector<1x128xf32>
    %c1_8 = arith.constant 1 : index
    %61 = memref.load %arg3[%c1_8] : memref<10xf32, #tpu.memory_space<smem>>
    %62 = vector.broadcast %61 : f32 to vector<1x128xf32>
    %63 = arith.mulf %62, %24 : vector<1x128xf32>
    %64 = arith.addf %60, %63 : vector<1x128xf32>
    %c2_9 = arith.constant 2 : index
    %65 = memref.load %arg3[%c2_9] : memref<10xf32, #tpu.memory_space<smem>>
    %66 = vector.broadcast %65 : f32 to vector<1x128xf32>
    %67 = arith.mulf %66, %35 : vector<1x128xf32>
    %68 = arith.addf %64, %67 : vector<1x128xf32>
    %c3_10 = arith.constant 3 : index
    %69 = memref.load %arg3[%c3_10] : memref<10xf32, #tpu.memory_space<smem>>
    %70 = vector.broadcast %69 : f32 to vector<1x128xf32>
    %71 = arith.mulf %70, %46 : vector<1x128xf32>
    %72 = arith.addf %68, %71 : vector<1x128xf32>
    %c4_11 = arith.constant 4 : index
    %73 = memref.load %arg3[%c4_11] : memref<10xf32, #tpu.memory_space<smem>>
    %74 = vector.broadcast %73 : f32 to vector<1x128xf32>
    %75 = arith.mulf %74, %57 : vector<1x128xf32>
    %76 = arith.addf %72, %75 : vector<1x128xf32>
    %c0_12 = arith.constant 0 : index
    %77 = memref.load %arg4[%c0_12] : memref<2xf32, #tpu.memory_space<smem>>
    %78 = vector.broadcast %77 : f32 to vector<1x128xf32>
    %79 = arith.addf %76, %78 : vector<1x128xf32>
    %c5_13 = arith.constant 5 : index
    %80 = memref.load %arg3[%c5_13] : memref<10xf32, #tpu.memory_space<smem>>
    %81 = vector.broadcast %80 : f32 to vector<1x128xf32>
    %82 = arith.mulf %81, %13 : vector<1x128xf32>
    %c6_14 = arith.constant 6 : index
    %83 = memref.load %arg3[%c6_14] : memref<10xf32, #tpu.memory_space<smem>>
    %84 = vector.broadcast %83 : f32 to vector<1x128xf32>
    %85 = arith.mulf %84, %24 : vector<1x128xf32>
    %86 = arith.addf %82, %85 : vector<1x128xf32>
    %c7_15 = arith.constant 7 : index
    %87 = memref.load %arg3[%c7_15] : memref<10xf32, #tpu.memory_space<smem>>
    %88 = vector.broadcast %87 : f32 to vector<1x128xf32>
    %89 = arith.mulf %88, %35 : vector<1x128xf32>
    %90 = arith.addf %86, %89 : vector<1x128xf32>
    %c8_16 = arith.constant 8 : index
    %91 = memref.load %arg3[%c8_16] : memref<10xf32, #tpu.memory_space<smem>>
    %92 = vector.broadcast %91 : f32 to vector<1x128xf32>
    %93 = arith.mulf %92, %46 : vector<1x128xf32>
    %94 = arith.addf %90, %93 : vector<1x128xf32>
    %c9_17 = arith.constant 9 : index
    %95 = memref.load %arg3[%c9_17] : memref<10xf32, #tpu.memory_space<smem>>
    %96 = vector.broadcast %95 : f32 to vector<1x128xf32>
    %97 = arith.mulf %96, %57 : vector<1x128xf32>
    %98 = arith.addf %94, %97 : vector<1x128xf32>
    %c1_18 = arith.constant 1 : index
    %99 = memref.load %arg4[%c1_18] : memref<2xf32, #tpu.memory_space<smem>>
    %100 = vector.broadcast %99 : f32 to vector<1x128xf32>
    %101 = arith.addf %98, %100 : vector<1x128xf32>
    %102 = tpu.concatenate %79, %101 in 0 : vector<1x128xf32>, vector<1x128xf32> -> vector<2x128xf32>
    %c0_19 = arith.constant 0 : index
    %c0_20 = arith.constant 0 : index
    %103 = vector.load %arg6[%c0_19, %c0_20] : memref<2x128xf32, #tpu.memory_space<vmem>>, vector<2x128xf32>
    tpu.vector_store %arg6[%c0_19, %c0_20], %102 {strides = array<i32>} : memref<2x128xf32, #tpu.memory_space<vmem>>, vector<2x128xf32>,
    return
  }
  func.func @transform_0(%arg0: i32) -> i32 {
    %c0_i32 = arith.constant 0 : i32
    %c0_i32_0 = arith.constant 0 : i32
    return %c0_i32 : i32
  }
  func.func @transform_1(%arg0: i32) -> i32 {
    %c0_i32 = arith.constant 0 : i32
    %c0_i32_0 = arith.constant 0 : i32
    return %c0_i32 : i32
  }
  func.func @transform_2(%arg0: i32) -> i32 {
    %c0_i32 = arith.constant 0 : i32
    %c0_i32_0 = arith.constant 0 : i32
    return %c0_i32 : i32
  }
  func.func @transform_3(%arg0: i32) -> i32 {
    %c0_i32 = arith.constant 0 : i32
    %c0_i32_0 = arith.constant 0 : i32
    return %c0_i32 : i32
  }
  func.func @transform_4(%arg0: i32) -> (i32, i32) {
    %c0_i32 = arith.constant 0 : i32
    %c0_i32_0 = arith.constant 0 : i32
    return %c0_i32, %arg0 : i32, i32
  }
  func.func @transform_5(%arg0: i32) -> (i32, i32) {
    %c0_i32 = arith.constant 0 : i32
    %c0_i32_0 = arith.constant 0 : i32
    return %c0_i32, %arg0 : i32, i32
  }
}

</mosaic_0001>

<bundles_post_ra>
// kernel: tpu_custom_call.1
= control target key start
LH: loop header
LB: loop body
LE: loop exit
PB: predicated region body
PF: predicated region fallthrough
CT: control target
= control target key end

     0   :  { %10 = vsyncpa [#allocation4], 0  ;;  %s375_s0 = inlined_call_operand.hbm [shape: f32[10], index: 0, kind: input, shape index: {}]   ;;  %s376_s1 = inlined_call_operand.vmem [shape: f32[5], index: 1, kind: input, shape index: {}]   ;;  %s377_s2 = inlined_call_operand.hbm [shape: f32[10], index: 2, kind: input, shape index: {}]   ;;  %s378_s3 = inlined_call_operand.vmem [shape: f32[2], index: 3, kind: input, shape index: {}]   ;;  %s379_s4 = inlined_call_operand.vmem [shape: f32[2,128], index: 4, kind: input, shape index: {}]   ;;  %s380_s5 = inlined_call_operand.hbm [shape: f32[2,128], index: 5, kind: output, shape index: {}]  }
   0x1   :  { %11 = vsyncpa [#allocation5], 0 }
   0x2   :  { %12 = vsyncpa [#allocation8], 0 }
   0x3   :  { %13 = vsyncpa [#allocation10], 0 }
   0x4   :  { %14 = vsyncpa [#allocation3], 0  ;;  %s29_s20 = sshll.u32 %s376_s1, 4  ;;  %s313_s21 = smov [#allocation2]   ;;  %s30_s20 = int_to_ptr.vmem [resolvable:$true] %s29_s20 }
   0x5   :  { %22 = dma.hbm_to_smem %s375_s0, 16, %s313_s21, [#allocation4]  }
   0x6   :  { %s251_s24 = scalar_lea.vmem %s30_s20, 16  ;;  %p256_p1 = scmp.lt.s32.totalorder %s30_s20, %s30_s20 }
   0x7   :  { %p252_p0 = scmp.ne.s32.totalorder %s30_s20, %s251_s24  ;;  %p257_p2 = scmp.lt.s32.totalorder %s251_s24, %s251_s24 }
   0x9   :  { %p258_p3 = por %p257_p2, %p256_p1 }
   0xb   :  { %p259_p4 = pnand %p258_p3, %p252_p0 }
   0xd   :  { %262 = shalt.err (!%p259_p4)
}
   0xe   :  { %s314_s25 = smov [#allocation6]   ;;  %s47_s28 = sshll.u32 %s378_s3, 4  ;;  %s48_s28 = int_to_ptr.vmem [resolvable:$true] %s47_s28 }
   0xf   :  { %32 = dma.vmem_to_smem %s30_s20, 16, %s314_s25, [#allocation5]  }
  0x10   :  { %s315_s1 = smov [#allocation7]   ;;  %s271_s0 = scalar_lea.vmem %s48_s28, 16 }
  0x11   :  { %40 = dma.hbm_to_smem %s377_s2, 16, %s315_s1, [#allocation8]  }
  0x12   :  { %p272_p5 = scmp.ne.s32.totalorder %s48_s28, %s271_s0  ;;  %p276_p6 = scmp.lt.s32.totalorder %s48_s28, %s48_s28 }
  0x13   :  { %p277_p7 = scmp.lt.s32.totalorder %s271_s0, %s271_s0 }
  0x15   :  { %p278_p8 = por %p277_p7, %p276_p6 }
  0x17   :  { %p279_p9 = pnand %p278_p8, %p272_p5 }
  0x19   :  { %282 = shalt.err (!%p279_p9)
}
  0x1a   :  { %s316_s6 = smov [#allocation9]  }
  0x1b   :  { %50 = dma.vmem_to_smem %s48_s28, 16, %s316_s6, [#allocation10]  }
  0x1c   :  { %303 = dma.done.wait [#allocation4], 16  }
  0x1d   :  { %304 = vsyncadd [#allocation4], 4294967280 }
  0x1e   :  { %305 = dma.done.wait [#allocation5], 16  }
  0x1f   :  { %306 = vsyncadd [#allocation5], 4294967280 }
  0x20   :  { %307 = dma.done.wait [#allocation8], 16  }
  0x21   :  { %308 = vsyncadd [#allocation8], 4294967280 }
  0x22   :  { %309 = dma.done.wait [#allocation10], 16  }
  0x23   :  { %310 = vsyncadd [#allocation10], 4294967280 }
  0x24   :  { %65 = sfence }
  0x25   :  { %s67_s2 = sld [smem:[#allocation2]]  ;;  %v66_v0 = vld [vmem:[%s379_s4] sm:$0x3]  ;;  %s317_s6 = smov [#allocation11]   ;;  %vm184_vm0 = vcmask 1040384  }
  0x26   :  { %s205_s3 = sld [smem:[#allocation2 + $0x1]] }
  0x27   :  { %s77_s7 = sld [smem:[#allocation6]] }
  0x28   :  { %s206_s8 = sld [smem:[#allocation2 + $0x2]] }
  0x29   :  { %s207_s9 = sld [smem:[#allocation2 + $0x3]] }
  0x2a   :  { %s363_s12 = sld [smem:[#allocation6 + $0x1]] }
  0x2b   :  { %v68_v1 = vstv %s67_s2  ;;  %s209_s13 = sld [smem:[#allocation2 + $0x4]]  ;;  %s193_s2 = sshll.u32 %s317_s6, 4  ;;  %s194_s2 = int_to_ptr.vmem [resolvable:$true] %s193_s2 }
  0x2c   :  { %v71_v2 = vstv %s205_s3  ;;  %s210_s14 = sld [smem:[#allocation2 + $0x5]]  ;;  %v69_v3 = vmul.f32 %v68_v1, %v66_v0  ;;  %s283_s3 = scalar_lea.vmem %s194_s2, 32 }
  0x2d   :  { %v72_v4 = vmul.f32 %v71_v2, %v66_v0  ;;  %s365_s15 = sld [smem:[#allocation6 + $0x2]]  ;;  %v78_v8 = vstv %s77_s7  ;;  %p284_p10 = scmp.ne.s32.totalorder %s194_s2, %s283_s3 }
  0x2e   :  { %v82_v5 = vstv %s206_s8  ;;  %s212_s16 = sld [smem:[#allocation2 + $0x6]]  ;;  %p288_p11 = scmp.lt.s32.totalorder %s194_s2, %s194_s2 }
  0x2f   :  { %v74_v6 = vrot.slane %v72_v4, 1  ;;  %v85_v7 = vstv %s207_s9  ;;  %s213_s17 = sld [smem:[#allocation2 + $0x7]]  ;;  %v83_v9 = vmul.f32 %v82_v5, %v66_v0  ;;  %p289_p12 = scmp.lt.s32.totalorder %s283_s3, %s283_s3 }
  0x30   :  { %v86_v10 = vmul.f32 %v85_v7, %v66_v0  ;;  %s367_s4 = sld [smem:[#allocation6 + $0x3]]  ;;  %v92_v16 = vstv %s363_s12 }
  0x31   :  { %v76_v11 = vadd.f32 %v74_v6, %v69_v3  ;;  %v96_v12 = vstv %s209_s13  ;;  %s215_s18 = sld [smem:[#allocation2 + $0x8]]  ;;  %p290_p13 = por %p289_p12, %p288_p11 }
  0x32   :  { %v88_v13 = vrot.slane %v86_v10, 1  ;;  %v99_v14 = vstv %s210_s14  ;;  %s216_s19 = sld [smem:[#allocation2 + $0x9]]  ;;  %v97_v17 = vmul.f32 %v96_v12, %v66_v0 }
  0x33   :  { %v79_v15 = vadd.f32 %v78_v8, %v76_v11  ;;  %v100_v18 = vmul.f32 %v99_v14, %v66_v0  ;;  %s217_s20 = sld [smem:[#allocation6 + $0x4]]  ;;  %v106_v24 = vstv %s365_s15  ;;  %p291_p0 = pnand %p290_p13, %p284_p10 }
  0x34   :  { %v90_v19 = vadd.f32 %v88_v13, %v83_v9  ;;  %v110_v20 = vstv %s212_s16  ;;  %s137_s21 = sld [smem:[#allocation7]] }
  0x35   :  { %233 = vtanh.f32 %v79_v15  ;;  %v102_v21 = vrot.slane %v100_v18, 1  ;;  %v113_v22 = vstv %s213_s17  ;;  %v111_v25 = vmul.f32 %v110_v20, %v66_v0  ;;  %s218_s22 = sld [smem:[#allocation7 + $0x1]] }
  0x36   :  { %v93_v23 = vadd.f32 %v92_v16, %v90_v19  ;;  %v114_v26 = vmul.f32 %v113_v22, %v66_v0  ;;  %v120_v32 = vstv %s367_s4  ;;  %s222_s23 = sld [smem:[#allocation7 + $0x5]] }
  0x37   :  { %v104_v27 = vadd.f32 %v102_v21, %v97_v17  ;;  %v124_v28 = vstv %s215_s18  ;;  %s223_s24 = sld [smem:[#allocation7 + $0x6]] }
  0x38   :  { %235 = vtanh.f32 %v93_v23  ;;  %v116_v29 = vrot.slane %v114_v26, 1  ;;  %v127_v30 = vstv %s216_s19  ;;  %v125_v33 = vmul.f32 %v124_v28, %v66_v0  ;;  %s219_s25 = sld [smem:[#allocation7 + $0x2]] }
  0x39   :  { %v107_v31 = vadd.f32 %v106_v24, %v104_v27  ;;  %v128_v34 = vmul.f32 %v127_v30, %v66_v0  ;;  %v134_v38 = vstv %s217_s20  ;;  %s224_s26 = sld [smem:[#allocation7 + $0x7]] }
  0x3a   :  { %v118_v35 = vadd.f32 %v116_v29, %v111_v25  ;;  %s220_s27 = sld [smem:[#allocation7 + $0x3]]  ;;  %v138_v41 = vstv %s137_s21 }
  0x3b   :  { %237 = vtanh.f32 %v107_v31  ;;  %v130_v36 = vrot.slane %v128_v34, 1  ;;  %s225_s28 = sld [smem:[#allocation7 + $0x8]]  ;;  %v141_v44 = vstv %s218_s22 }
  0x3c   :  { %v121_v37 = vadd.f32 %v120_v32, %v118_v35  ;;  %v160_v42 = vstv %s222_s23  ;;  %s221_s1 = sld [smem:[#allocation7 + $0x4]] }
  0x3d   :  { %v132_v39 = vadd.f32 %v130_v36, %v125_v33  ;;  %v163_v45 = vstv %s223_s24  ;;  %s226_s29 = sld [smem:[#allocation7 + $0x9]] }
  0x3e   :  { %239 = vtanh.f32 %v121_v37  ;;  %v145_v50 = vstv %s219_s25  ;;  %s156_s30 = sld [smem:[#allocation9]] }
  0x3f   :  { %v135_v40 = vadd.f32 %v134_v38, %v132_v39  ;;  %v167_v52 = vstv %s224_s26  ;;  %s227_s0 = sld [smem:[#allocation9 + $0x1]] }
  0x40   :  { %v149_v57 = vstv %s220_s27 }
  0x41   :  { %241 = vtanh.f32 %v135_v40  ;;  %v171_v59 = vstv %s225_s28 }
  0x42   :  { %v234_v43 = vpop.eup %233  ;;  %v153_v0 = vstv %s221_s1 }
  0x43   :  { %v139_v46 = vmul.f32 %v234_v43, %v138_v41  ;;  %v161_v47 = vmul.f32 %v234_v43, %v160_v42  ;;  %v175_v2 = vstv %s226_s29 }
  0x44   :  { %v157_v8 = vstv %s156_s30 }
  0x45   :  { %v236_v48 = vpop.eup %235  ;;  %v179_v9 = vstv %s227_s0 }
  0x46   :  { %v142_v49 = vmul.f32 %v236_v48, %v141_v44  ;;  %v164_v51 = vmul.f32 %v236_v48, %v163_v45 }
  0x48   :  { %v238_v53 = vpop.eup %237  ;;  %v143_v54 = vadd.f32 %v142_v49, %v139_v46  ;;  %v165_v55 = vadd.f32 %v164_v51, %v161_v47 }
  0x49   :  { %v146_v56 = vmul.f32 %v238_v53, %v145_v50  ;;  %v168_v58 = vmul.f32 %v238_v53, %v167_v52 }
  0x4b   :  { %v240_v60 = vpop.eup %239  ;;  %v147_v61 = vadd.f32 %v146_v56, %v143_v54  ;;  %v169_v62 = vadd.f32 %v168_v58, %v165_v55 }
  0x4c   :  { %v150_v63 = vmul.f32 %v240_v60, %v149_v57  ;;  %v172_v1 = vmul.f32 %v240_v60, %v171_v59 }
  0x4e   :  { %v242_v3 = vpop.eup %241  ;;  %v151_v4 = vadd.f32 %v150_v63, %v147_v61  ;;  %v173_v5 = vadd.f32 %v172_v1, %v169_v62 }
  0x4f   :  { %v154_v6 = vmul.f32 %v242_v3, %v153_v0  ;;  %v176_v7 = vmul.f32 %v242_v3, %v175_v2 }
  0x51   :  { %v155_v10 = vadd.f32 %v154_v6, %v151_v4  ;;  %v177_v11 = vadd.f32 %v176_v7, %v173_v5 }
  0x53   :  { %v158_v12 = vadd.f32 %v157_v8, %v155_v10  ;;  %v180_v13 = vadd.f32 %v179_v9, %v177_v11 }
  0x55   :  { %v182_v14 = vrot.slane %v180_v13, 7 }
  0x57   :  { %v185_v15 = vsel %vm184_vm0, %v158_v12, %v182_v14 }
  0x58   :  { %186 = vst [vmem:[#allocation11] sm:$0x3] %v185_v15 }
  0x59   :  { %294 = shalt.err (!%p291_p0)
}
  0x5a   :  { %196 = dma.vmem_to_hbm [thread:$0]  %s194_s2, 32, %s380_s5, [#allocation3]  }
  0x5b   :  { %311 = dma.done.wait [#allocation3], 32  }
  0x5c   :  { %312 = vsyncadd [#allocation3], 4294967264 }
  0x5d   :  { %200 = vsyncpa [#allocation3], 1 }
  0x5e   :  { %201 = vsyncpa [#allocation4], 1 }
  0x5f   :  { %202 = vsyncpa [#allocation8], 1 }
  0x60   :  { %203 = vsyncpa [#allocation5], 1 }
  0x61   :  { %204 = vsyncpa [#allocation10], 1 }

</bundles_post_ra>
